<compile_context>
chip_gen: v5e
topology: v5e:2x2
jax: 0.10.0
libtpu: 0.0.40
codegen_flags: <defaults>
</compile_context>

<pallas_src>
import jax
import jax.numpy as jnp
from jax import lax
from jax.experimental import pallas as pl
from jax.experimental.pallas import tpu as pltpu

BN_EPS = 1e-5


def _pick_row_tile(lp, target=256):
    """Largest divisor of lp <= target (multiple of 8 when actually tiling)."""
    if lp <= target:
        return lp
    for t in range(target, 7, -1):
        if lp % t == 0 and t % 8 == 0:
            return t
    return lp  # fall back to a single tile over rows


# ---------------------------------------------------------------------------
# Pass 1: per-channel sum / sum-of-squares for BatchNorm batch statistics.
# Input is pre-packed as (N, L/2, 2*Cin); channel c lives in lanes c and Cin+c.
# ---------------------------------------------------------------------------
def _bn_stats_kernel(x_ref, sum_ref, sq_ref):
    @pl.when(pl.program_id(1) == 0)
    def _init():
        sum_ref[...] = jnp.zeros_like(sum_ref)
        sq_ref[...] = jnp.zeros_like(sq_ref)

    x = x_ref[...].astype(jnp.float32)                 # (Lt, 2*Cin)
    sum_ref[...] += jnp.sum(x, axis=0, keepdims=True)  # (1, 2*Cin)
    sq_ref[...] += jnp.sum(x * x, axis=0, keepdims=True)


# ---------------------------------------------------------------------------
# Pass 2: fused  BN(FMA) -> ReLU -> pairwise avg-pool -> 1x1 conv (MXU).
# ---------------------------------------------------------------------------
def _transition_kernel(x_ref, a_ref, b_ref, w_ref, o_ref):
    c = a_ref.shape[-1]
    x = x_ref[...].astype(jnp.float32)        # (Lt, 2*Cin)
    a = a_ref[...]                            # (1, Cin)  = gamma * rsqrt(var+eps)
    b = b_ref[...]                            # (1, Cin)  = beta - mean * a

    # BN as a single FMA + ReLU on both pooling partners, then pairwise add.
    # (0.5 average factor is folded into the conv weight.)
    ye = jnp.maximum(x[:, :c] * a + b, 0.0)   # even time steps
    yo = jnp.maximum(x[:, c:] * a + b, 0.0)   # odd time steps
    pooled = (ye + yo).astype(jnp.bfloat16)   # (Lt, Cin)

    # 1x1 conv == channel contraction: bf16 inputs, f32 accumulation on MXU.
    o_ref[...] = jnp.dot(
        pooled, w_ref[...], preferred_element_type=jnp.float32
    ).astype(o_ref.dtype)


def transition_forward(x, conv_w, gamma, beta):
    """x: (N, Cin, L) f32; conv_w: (Cout, Cin); gamma/beta: (Cin,).

    Returns AvgPool1d(Conv1d(ReLU(BatchNorm1d(x)))) of shape (N, Cout, L//2).
    """
    N, C, L = x.shape
    assert L % 2 == 0, "AvgPool1d(kernel_size=2, stride=2) path assumes even L"
    Cout = conv_w.shape[0]
    Lp = L // 2
    Lt = _pick_row_tile(Lp)
    grid = (N, Lp // Lt)

    # Channels-last + pack the two pooling partners into the lane dimension:
    #   (N, Cin, L) -> (N, L, Cin) -> (N, L/2, 2*Cin)   (the reshape is free).
    xp = jnp.transpose(x, (0, 2, 1)).reshape(N, Lp, 2 * C)

    # ---- pass 1: batch statistics (tiled Pallas reduction) -----------------
    ssum, ssq = pl.pallas_call(
        _bn_stats_kernel,
        out_shape=(
            jax.ShapeDtypeStruct((N, 1, 2 * C), jnp.float32),
            jax.ShapeDtypeStruct((N, 1, 2 * C), jnp.float32),
        ),
        grid_spec=pl.GridSpec(
            grid=grid,
            in_specs=(
                pl.BlockSpec((None, Lt, 2 * C), lambda n, j: (n, j, 0)),
            ),
            out_specs=(
                pl.BlockSpec((None, 1, 2 * C), lambda n, j: (n, 0, 0)),
                pl.BlockSpec((None, 1, 2 * C), lambda n, j: (n, 0, 0)),
            ),
        ),
        compiler_params=pltpu.CompilerParams(
            dimension_semantics=("parallel", "arbitrary")),
    )(xp)

    # Finish the tiny reduction and fold BN into one scale/shift per channel.
    # f32 sums + clamp guard the one-pass variance against cancellation.
    cnt = jnp.float32(N * L)
    s = jnp.sum(ssum[:, 0, :], axis=0)
    q = jnp.sum(ssq[:, 0, :], axis=0)
    s = s[:C] + s[C:]
    q = q[:C] + q[C:]
    mean = s / cnt
    var = jnp.maximum(q / cnt - mean * mean, 0.0)   # biased var (train-mode BN)
    a = (gamma.astype(jnp.float32) * lax.rsqrt(var + BN_EPS)).reshape(1, C)
    b = (beta.astype(jnp.float32) - mean * a[0]).reshape(1, C)

    # Fold the 0.5 avg-pool factor into the conv weight; bf16 for the MXU.
    w = (conv_w.astype(jnp.float32).T * 0.5).astype(jnp.bfloat16)   # (Cin, Cout)

    # ---- pass 2: fused main kernel, tiled and pipelined over (N, L/2) ------
    out_nlc = pl.pallas_call(
        _transition_kernel,
        out_shape=jax.ShapeDtypeStruct((N, Lp, Cout), x.dtype),
        grid_spec=pl.GridSpec(
            grid=grid,
            in_specs=(
                pl.BlockSpec((None, Lt, 2 * C), lambda n, j: (n, j, 0)),
                pl.BlockSpec((1, C), lambda n, j: (0, 0)),      # resident
                pl.BlockSpec((1, C), lambda n, j: (0, 0)),      # resident
                pl.BlockSpec((C, Cout), lambda n, j: (0, 0)),   # resident
            ),
            out_specs=pl.BlockSpec((None, Lt, Cout), lambda n, j: (n, j, 0)),
        ),
        compiler_params=pltpu.CompilerParams(
            dimension_semantics=("parallel", "parallel")),
    )(xp, a, b, w)

    return jnp.transpose(out_nlc, (0, 2, 1))        # back to (N, Cout, L/2)


def transition_reference(x, conv_w, gamma, beta):
    """Pure-JAX reference matching PyTorch _Transition (train-mode BN), f32."""
    mean = jnp.mean(x, axis=(0, 2), keepdims=True)
    var = jnp.mean((x - mean) ** 2, axis=(0, 2), keepdims=True)
    xn = (x - mean) * lax.rsqrt(var + BN_EPS)
    xn = xn * gamma.reshape(1, -1, 1) + beta.reshape(1, -1, 1)
    xr = jnp.maximum(xn, 0.0)
    y = jnp.einsum("ncl,oc->nol", xr, conv_w)
    return (y[..., 0::2] + y[..., 1::2]) * 0.5


if __name__ == "__main__":
    # Small shapes consistent with the module: batch=2, C_in=8, C_out=4, L=16.
    N, C_IN, C_OUT, L = 2, 8, 4, 16

    key = jax.random.PRNGKey(0)
    kx, kw, kg, kb = jax.random.split(key, 4)

    x = jax.random.normal(kx, (N, C_IN, L), dtype=jnp.float32)
    # Conv1d weight in torch is (C_out, C_in, 1); k=1 -> use (C_out, C_in).
    conv_w = 0.1 * jax.random.normal(kw, (C_OUT, C_IN), dtype=jnp.float32)
    gamma = 1.0 + 0.1 * jax.random.normal(kg, (C_IN,), dtype=jnp.float32)
    beta = 0.1 * jax.random.normal(kb, (C_IN,), dtype=jnp.float32)

    fwd = jax.jit(transition_forward)
    out = jax.block_until_ready(fwd(x, conv_w, gamma, beta))

    ref = transition_reference(x, conv_w, gamma, beta)
    assert out.shape == (N, C_OUT, L // 2), out.shape
    # Tolerance accounts for the bf16 MXU contraction (f32 accumulation).
    assert jnp.allclose(out, ref, rtol=2e-2, atol=2e-2), (
        float(jnp.max(jnp.abs(out - ref)))
    )

    print("KERNEL_OK")
</pallas_src>

<mosaic_0001>
module attributes {stable_mosaic.version = 11 : i64} {
  func.func @_bn_stats_kernel(%arg0: i32, %arg1: i32, %arg2: memref<1x8x16xf32, #tpu.memory_space<vmem>>, %arg3: memref<1x1x16xf32, #tpu.memory_space<vmem>>, %arg4: memref<1x1x16xf32, #tpu.memory_space<vmem>>) attributes {dimension_semantics = [#tpu.dimension_semantics<parallel>, #tpu.dimension_semantics<arbitrary>], iteration_bounds = array<i64: 2, 1>, scalar_prefetch = 0 : i64, scratch_operands = 0 : i64, tpu.core_type = #tpu.core_type<tc>, window_params = [{transform_indices = @transform_0, window_bounds = array<i64: 1, 8, 16>}, {transform_indices = @transform_1, window_bounds = array<i64: 1, 1, 16>}, {transform_indices = @transform_2, window_bounds = array<i64: 1, 1, 16>}]} {
    %c0_i32 = arith.constant 0 : i32
    %0 = arith.cmpi eq, %arg1, %c0_i32 : i32
    %1 = arith.extui %0 : i1 to i32
    %c0_i32_0 = arith.constant 0 : i32
    %2 = arith.cmpi ne, %1, %c0_i32_0 : i32
    scf.if %2 {
      %cst_16 = arith.constant 0.000000e+00 : f32
      %22 = vector.broadcast %cst_16 : f32 to vector<1x16xf32>
      %c0_17 = arith.constant 0 : index
      %c0_18 = arith.constant 0 : index
      %c0_19 = arith.constant 0 : index
      %23 = vector.load %arg3[%c0_17, %c0_18, %c0_19] : memref<1x1x16xf32, #tpu.memory_space<vmem>>, vector<1x1x16xf32>
      %24 = vector.shape_cast %23 : vector<1x1x16xf32> to vector<1x16xf32>
      %25 = vector.shape_cast %22 : vector<1x16xf32> to vector<1x1x16xf32>
      tpu.vector_store %arg3[%c0_17, %c0_18, %c0_19], %25 {strides = array<i32>} : memref<1x1x16xf32, #tpu.memory_space<vmem>>, vector<1x1x16xf32>,
      %cst_20 = arith.constant 0.000000e+00 : f32
      %26 = vector.broadcast %cst_20 : f32 to vector<1x16xf32>
      %c0_21 = arith.constant 0 : index
      %c0_22 = arith.constant 0 : index
      %c0_23 = arith.constant 0 : index
      %27 = vector.load %arg4[%c0_21, %c0_22, %c0_23] : memref<1x1x16xf32, #tpu.memory_space<vmem>>, vector<1x1x16xf32>
      %28 = vector.shape_cast %27 : vector<1x1x16xf32> to vector<1x16xf32>
      %29 = vector.shape_cast %26 : vector<1x16xf32> to vector<1x1x16xf32>
      tpu.vector_store %arg4[%c0_21, %c0_22, %c0_23], %29 {strides = array<i32>} : memref<1x1x16xf32, #tpu.memory_space<vmem>>, vector<1x1x16xf32>,
    } else {
    }
    %c0 = arith.constant 0 : index
    %c0_1 = arith.constant 0 : index
    %c0_2 = arith.constant 0 : index
    %3 = vector.load %arg2[%c0, %c0_1, %c0_2] : memref<1x8x16xf32, #tpu.memory_space<vmem>>, vector<1x8x16xf32>
    %4 = vector.shape_cast %3 : vector<1x8x16xf32> to vector<8x16xf32>
    %c0_3 = arith.constant 0 : index
    %c0_4 = arith.constant 0 : index
    %c0_5 = arith.constant 0 : index
    %5 = vector.load %arg3[%c0_3, %c0_4, %c0_5] : memref<1x1x16xf32, #tpu.memory_space<vmem>>, vector<1x1x16xf32>
    %6 = vector.shape_cast %5 : vector<1x1x16xf32> to vector<1x16xf32>
    %cst = arith.constant dense<0.000000e+00> : vector<16xf32>
    %7 = vector.multi_reduction <add>, %4, %cst [0] : vector<8x16xf32> to vector<16xf32>
    %8 = vector.shape_cast %7 : vector<16xf32> to vector<1x16xf32>
    %9 = arith.addf %6, %8 : vector<1x16xf32>
    %c0_6 = arith.constant 0 : index
    %c0_7 = arith.constant 0 : index
    %c0_8 = arith.constant 0 : index
    %10 = vector.load %arg3[%c0_6, %c0_7, %c0_8] : memref<1x1x16xf32, #tpu.memory_space<vmem>>, vector<1x1x16xf32>
    %11 = vector.shape_cast %10 : vector<1x1x16xf32> to vector<1x16xf32>
    %12 = vector.shape_cast %9 : vector<1x16xf32> to vector<1x1x16xf32>
    tpu.vector_store %arg3[%c0_6, %c0_7, %c0_8], %12 {strides = array<i32>} : memref<1x1x16xf32, #tpu.memory_space<vmem>>, vector<1x1x16xf32>,
    %c0_9 = arith.constant 0 : index
    %c0_10 = arith.constant 0 : index
    %c0_11 = arith.constant 0 : index
    %13 = vector.load %arg4[%c0_9, %c0_10, %c0_11] : memref<1x1x16xf32, #tpu.memory_space<vmem>>, vector<1x1x16xf32>
    %14 = vector.shape_cast %13 : vector<1x1x16xf32> to vector<1x16xf32>
    %15 = arith.mulf %4, %4 : vector<8x16xf32>
    %cst_12 = arith.constant dense<0.000000e+00> : vector<16xf32>
    %16 = vector.multi_reduction <add>, %15, %cst_12 [0] : vector<8x16xf32> to vector<16xf32>
    %17 = vector.shape_cast %16 : vector<16xf32> to vector<1x16xf32>
    %18 = arith.addf %14, %17 : vector<1x16xf32>
    %c0_13 = arith.constant 0 : index
    %c0_14 = arith.constant 0 : index
    %c0_15 = arith.constant 0 : index
    %19 = vector.load %arg4[%c0_13, %c0_14, %c0_15] : memref<1x1x16xf32, #tpu.memory_space<vmem>>, vector<1x1x16xf32>
    %20 = vector.shape_cast %19 : vector<1x1x16xf32> to vector<1x16xf32>
    %21 = vector.shape_cast %18 : vector<1x16xf32> to vector<1x1x16xf32>
    tpu.vector_store %arg4[%c0_13, %c0_14, %c0_15], %21 {strides = array<i32>} : memref<1x1x16xf32, #tpu.memory_space<vmem>>, vector<1x1x16xf32>,
    return
  }
  func.func @transform_0(%arg0: i32, %arg1: i32) -> (i32, i32, i32) {
    %c0_i32 = arith.constant 0 : i32
    %c0_i32_0 = arith.constant 0 : i32
    return %arg0, %arg1, %c0_i32 : i32, i32, i32
  }
  func.func @transform_1(%arg0: i32, %arg1: i32) -> (i32, i32, i32) {
    %c0_i32 = arith.constant 0 : i32
    %c0_i32_0 = arith.constant 0 : i32
    %c0_i32_1 = arith.constant 0 : i32
    return %arg0, %c0_i32, %c0_i32_0 : i32, i32, i32
  }
  func.func @transform_2(%arg0: i32, %arg1: i32) -> (i32, i32, i32) {
    %c0_i32 = arith.constant 0 : i32
    %c0_i32_0 = arith.constant 0 : i32
    %c0_i32_1 = arith.constant 0 : i32
    return %arg0, %c0_i32, %c0_i32_0 : i32, i32, i32
  }
}

module attributes {stable_mosaic.version = 11 : i64} {
  func.func @_transition_kernel(%arg0: i32, %arg1: i32, %arg2: memref<1x8x16xf32, #tpu.memory_space<vmem>>, %arg3: memref<1x8xf32, #tpu.memory_space<vmem>>, %arg4: memref<1x8xf32, #tpu.memory_space<vmem>>, %arg5: memref<8x4xbf16, #tpu.memory_space<vmem>>, %arg6: memref<1x8x4xf32, #tpu.memory_space<vmem>>) attributes {dimension_semantics = [#tpu.dimension_semantics<parallel>, #tpu.dimension_semantics<parallel>], iteration_bounds = array<i64: 2, 1>, scalar_prefetch = 0 : i64, scratch_operands = 0 : i64, tpu.core_type = #tpu.core_type<tc>, window_params = [{transform_indices = @transform_0, window_bounds = array<i64: 1, 8, 16>}, {pipeline_mode = #tpu.pipeline_mode<synchronous>, transform_indices = @transform_1, window_bounds = array<i64: 1, 8>}, {pipeline_mode = #tpu.pipeline_mode<synchronous>, transform_indices = @transform_2, window_bounds = array<i64: 1, 8>}, {pipeline_mode = #tpu.pipeline_mode<synchronous>, transform_indices = @transform_3, window_bounds = array<i64: 8, 4>}, {transform_indices = @transform_4, window_bounds = array<i64: 1, 8, 4>}]} {
    %c0 = arith.constant 0 : index
    %c0_0 = arith.constant 0 : index
    %c0_1 = arith.constant 0 : index
    %0 = vector.load %arg2[%c0, %c0_0, %c0_1] : memref<1x8x16xf32, #tpu.memory_space<vmem>>, vector<1x8x16xf32>
    %1 = vector.shape_cast %0 : vector<1x8x16xf32> to vector<8x16xf32>
    %c0_2 = arith.constant 0 : index
    %c0_3 = arith.constant 0 : index
    %2 = vector.load %arg3[%c0_2, %c0_3] : memref<1x8xf32, #tpu.memory_space<vmem>>, vector<1x8xf32>
    %c0_4 = arith.constant 0 : index
    %c0_5 = arith.constant 0 : index
    %3 = vector.load %arg4[%c0_4, %c0_5] : memref<1x8xf32, #tpu.memory_space<vmem>>, vector<1x8xf32>
    %4 = vector.extract_strided_slice %1 {offsets = [0, 0], sizes = [8, 8], strides = [1, 1]} : vector<8x16xf32> to vector<8x8xf32>
    %5 = vector.broadcast %2 : vector<1x8xf32> to vector<8x8xf32>
    %6 = arith.mulf %4, %5 : vector<8x8xf32>
    %7 = vector.broadcast %3 : vector<1x8xf32> to vector<8x8xf32>
    %8 = arith.addf %6, %7 : vector<8x8xf32>
    %cst = arith.constant 0.000000e+00 : f32
    %9 = vector.broadcast %cst : f32 to vector<8x8xf32>
    %10 = arith.maximumf %8, %9 : vector<8x8xf32>
    %11 = vector.extract_strided_slice %1 {offsets = [0, 8], sizes = [8, 8], strides = [1, 1]} : vector<8x16xf32> to vector<8x8xf32>
    %12 = vector.broadcast %2 : vector<1x8xf32> to vector<8x8xf32>
    %13 = arith.mulf %11, %12 : vector<8x8xf32>
    %14 = vector.broadcast %3 : vector<1x8xf32> to vector<8x8xf32>
    %15 = arith.addf %13, %14 : vector<8x8xf32>
    %cst_6 = arith.constant 0.000000e+00 : f32
    %16 = vector.broadcast %cst_6 : f32 to vector<8x8xf32>
    %17 = arith.maximumf %15, %16 : vector<8x8xf32>
    %18 = arith.addf %10, %17 : vector<8x8xf32>
    %19 = arith.truncf %18 : vector<8x8xf32> to vector<8x8xbf16>
    %c0_7 = arith.constant 0 : index
    %c0_8 = arith.constant 0 : index
    %20 = vector.load %arg5[%c0_7, %c0_8] : memref<8x4xbf16, #tpu.memory_space<vmem>>, vector<8x4xbf16>
    %cst_9 = arith.constant dense<0.000000e+00> : vector<8x4xf32>
    %21 = tpu.matmul %19, %20, %cst_9 {dimension_numbers = #tpu.dot_dimension_numbers<[1], [0], [0], [1], [0, 0, 1, 1], [], []>} : vector<8x8xbf16>, vector<8x4xbf16>, vector<8x4xf32> -> vector<8x4xf32>
    %c0_10 = arith.constant 0 : index
    %c0_11 = arith.constant 0 : index
    %c0_12 = arith.constant 0 : index
    %22 = vector.load %arg6[%c0_10, %c0_11, %c0_12] : memref<1x8x4xf32, #tpu.memory_space<vmem>>, vector<1x8x4xf32>
    %23 = vector.shape_cast %22 : vector<1x8x4xf32> to vector<8x4xf32>
    %24 = vector.shape_cast %21 : vector<8x4xf32> to vector<1x8x4xf32>
    tpu.vector_store %arg6[%c0_10, %c0_11, %c0_12], %24 {strides = array<i32>} : memref<1x8x4xf32, #tpu.memory_space<vmem>>, vector<1x8x4xf32>,
    return
  }
  func.func @transform_0(%arg0: i32, %arg1: i32) -> (i32, i32, i32) {
    %c0_i32 = arith.constant 0 : i32
    %c0_i32_0 = arith.constant 0 : i32
    return %arg0, %arg1, %c0_i32 : i32, i32, i32
  }
  func.func @transform_1(%arg0: i32, %arg1: i32) -> (i32, i32) {
    %c0_i32 = arith.constant 0 : i32
    %c0_i32_0 = arith.constant 0 : i32
    %c0_i32_1 = arith.constant 0 : i32
    return %c0_i32, %c0_i32_0 : i32, i32
  }
  func.func @transform_2(%arg0: i32, %arg1: i32) -> (i32, i32) {
    %c0_i32 = arith.constant 0 : i32
    %c0_i32_0 = arith.constant 0 : i32
    %c0_i32_1 = arith.constant 0 : i32
    return %c0_i32, %c0_i32_0 : i32, i32
  }
  func.func @transform_3(%arg0: i32, %arg1: i32) -> (i32, i32) {
    %c0_i32 = arith.constant 0 : i32
    %c0_i32_0 = arith.constant 0 : i32
    %c0_i32_1 = arith.constant 0 : i32
    return %c0_i32, %c0_i32_0 : i32, i32
  }
  func.func @transform_4(%arg0: i32, %arg1: i32) -> (i32, i32, i32) {
    %c0_i32 = arith.constant 0 : i32
    %c0_i32_0 = arith.constant 0 : i32
    return %arg0, %arg1, %c0_i32 : i32, i32, i32
  }
}

</mosaic_0001>

<bundles_post_ra>
// kernel: transition_forward.2
= control target key start
LH: loop header
LB: loop body
LE: loop exit
PB: predicated region body
PF: predicated region fallthrough
CT: control target
= control target key end

     0   :  { %s356_s9 = smov 0   ;;  %s358_s10 = smov 0   ;;  %s396_s0 = inlined_call_operand.vmem [shape: f32[2,8,16], index: 0, kind: input, shape index: {}]   ;;  %s397_s1 = inlined_call_operand.vmem [shape: f32[2,1,16], index: 1, kind: output, shape index: {0}]   ;;  %s398_s2 = inlined_call_operand.vmem [shape: f32[2,1,16], index: 2, kind: output, shape index: {1}]  }
   0x1   :  { %s360_s11 = smov 0  }
   0x2 LB: > { %s25_s12 = sadd.s32 1, %s334_s10  ;;  %p287_p0 = scmp.ge.s32.totalorder %s338_s11, 1  ;;  %s338_s11 = sphi %s360_s11, %s13_s11   ;;  %s334_s10 = sphi %s358_s10, %s400_s10   ;;  %s330_s9 = sphi %s356_s9, %s399_s9  }
   0x3   : > { %p27_p1 = scmp.ge.s32.totalorder %s25_s12, 2  ;;  %p131_p2 = scmp.lt.s32.totalorder %s338_s11, 3 }
   0x5   : > { %s402_s12 = smov (%p27_p1, %s25_s12), 0  ;;  %p132_p3 = pnand %p287_p0, %p131_p2 }
   0x6   : > { %p156_p4 = scmp.lt.s32.totalorder (!%p132_p3), %s330_s9, 1 }
   0x7   : > { %135 = sbr.rel (%p132_p3) target bundleno = 34 (0x22), region = 24 }
   0xc   : > { %s404_s9 = smov (!%p156_p4, %s330_s9), 1  ;;  %vm173_vm0 = vcmask 122880   ;;  %vm178_vm1 = vcmask 130048   ;;  %v340_v0 = vmov 0.0  }
   0xd   : > { %s288_s13 = sshll.u32 %s404_s9, 3  ;;  %s165_s16 = scalar_lea.vmem %s397_s1, %s404_s9 }
   0xe   : > { %s162_s19 = scalar_lea.vmem %s396_s0, %s288_s13  ;;  %174 = vst.msk [vmem:[%s165_s16] sm:$0x1] %vm173_vm0, %v340_v0  ;;  %s168_s22 = scalar_lea.vmem %s398_s2, %s404_s9 }
   0xf   : > { %v176_v1 = vld [vmem:[%s162_s19] sm:$0xff]  ;;  %175 = vst.msk [vmem:[%s168_s22] sm:$0x1] %vm173_vm0, %v340_v0 }
  0x10   : > { %v179_v2 = vsel %vm178_vm1, %v176_v1, 0.0  ;;  %v190_v3 = vmul.f32 %v176_v1, %v176_v1 }
  0x11   : > { %v180_v4 = vrot.slane %v179_v2, 4 }
  0x12   : > { %v191_v5 = vsel %vm178_vm1, %v190_v3, 0.0 }
  0x13   : > { %v181_v6 = vadd.f32 %v180_v4, %v179_v2  ;;  %v192_v7 = vrot.slane %v191_v5, 4 }
  0x15   : > { %v182_v8 = vrot.slane %v181_v6, 2  ;;  %v193_v9 = vadd.f32 %v192_v7, %v191_v5  ;;  %v177_v14 = vld [vmem:[%s165_s16] sm:$0x1] }
  0x16   : > { %v189_v17 = vld [vmem:[%s168_s22] sm:$0x1] }
  0x17   : > { %v183_v10 = vadd.f32 %v182_v8, %v181_v6  ;;  %v194_v11 = vrot.slane %v193_v9, 2 }
  0x19   : > { %v184_v12 = vrot.slane %v183_v10, 1  ;;  %v195_v13 = vadd.f32 %v194_v11, %v193_v9 }
  0x1b   : > { %v185_v15 = vadd.f32 %v184_v12, %v183_v10  ;;  %v196_v16 = vrot.slane %v195_v13, 1 }
  0x1d   : > { %v186_v18 = vadd.f32 %v185_v15, %v177_v14  ;;  %v197_v19 = vadd.f32 %v196_v16, %v195_v13 }
  0x1f   : > { %188 = vst.msk [vmem:[%s165_s16] sm:$0x1] %vm173_vm0, %v186_v18  ;;  %v198_v20 = vadd.f32 %v197_v19, %v189_v17 }
  0x21   : > { %199 = vst.msk [vmem:[%s168_s22] sm:$0x1] %vm173_vm0, %v198_v20 }
  0x22 PF: > { %s13_s11 = sadd.s32 1, %s338_s11   ;;  %s399_s9 = smov %s334_s10 }
  0x23   : > { %p10_p5 = scmp.ge.s32.totalorder %s13_s11, 4   ;;  %s400_s10 = smov %s402_s12 }
  0x25   :  { %12 = sbr.rel (!%p10_p5) target bundleno = 2 (0x2), region = 70 }

// kernel: transition_forward.3
= control target key start
LH: loop header
LB: loop body
LE: loop exit
PB: predicated region body
PF: predicated region fallthrough
CT: control target
= control target key end

     0   :  { %s439_s15 = smov 0   ;;  %s441_s16 = smov 0   ;;  %s481_s0 = inlined_call_operand.vmem [shape: f32[2,8,16], index: 0, kind: input, shape index: {}]   ;;  %s482_s1 = inlined_call_operand.vmem [shape: f32[1,8], index: 1, kind: input, shape index: {}]   ;;  %s483_s2 = inlined_call_operand.vmem [shape: f32[1,8], index: 2, kind: input, shape index: {}]   ;;  %s484_s3 = inlined_call_operand.vmem [shape: bf16[8,4], index: 3, kind: input, shape index: {}]   ;;  %s485_s4 = inlined_call_operand.vmem [shape: f32[2,8,4], index: 4, kind: output, shape index: {}]  }
   0x1   :  { %s443_s17 = smov 0  }
   0x2 LB: > { %s26_s18 = sadd.s32 1, %s406_s16  ;;  %p354_p0 = scmp.ge.s32.totalorder %s410_s17, 1  ;;  %s410_s17 = sphi %s443_s17, %s14_s17   ;;  %s406_s16 = sphi %s441_s16, %s487_s16   ;;  %s402_s15 = sphi %s439_s15, %s486_s15  }
   0x3   : > { %p28_p1 = scmp.ge.s32.totalorder %s26_s18, 2  ;;  %p180_p2 = scmp.lt.s32.totalorder %s410_s17, 3 }
   0x5   : > { %s489_s18 = smov (%p28_p1, %s26_s18), 0  ;;  %p181_p3 = pnand %p354_p0, %p180_p2 }
   0x6   : > { %s412_s21 = smov (!%p181_p3), 8   ;;  %p210_p4 = scmp.lt.s32.totalorder (!%p181_p3), %s402_s15, 1 }
   0x7   : > { %184 = sbr.rel (%p181_p3) target bundleno = 393 (0x189), region = 36  ;;  %s413_s28 = smov (!%p181_p3), 120  }
   0xc   : > { %v386_v0 = vld [vmem:[%s482_s1] ss:$0 sm:$0xff]  ;;  %s491_s15 = smov (!%p210_p4, %s402_s15), 1  ;;  %vm257_vm0 = vcmask 1043456   ;;  %vm253_vm1 = vcmask 64512   ;;  %vm274_vm2 = vcmask 31744  }
   0xd   : > { %237 = vrot.lane.b32.xlu0 %v386_v0, %s412_s21  ;;  %v387_v1 = vld [vmem:[%s483_s2] ss:$0 sm:$0xff]  ;;  %s355_s24 = sshll.u32 %s491_s15, 3 }
   0xe   : > { %s216_s27 = scalar_lea.vmem %s481_s0, %s355_s24  ;;  %v252_v8 = vld [vmem:[%s484_s3] sm:$0xf]  ;;  %s223_s7 = scalar_lea.vmem %s485_s4, %s355_s24 }
   0xf   : > { %v225_v3 = vld [vmem:[%s216_s27] sm:$0xff]  ;;  %v259_v9 = vsel %vm257_vm0, %v252_v8, 0 }
  0x10   : > { %268 = vmatpush.bf16.msra.mxu0 %v259_v9  ;;  %v231_v10 = vmul.f32 %v386_v0, %v225_v3 }
  0x12   : > { %v235_v11 = vadd.f32 %v387_v1, %v231_v10 }
  0x14   : > { %v236_v12 = vmax.f32 %v235_v11, 0.0 }
  0x15   : > { %241 = vrot.lane.b32.xlu0 %v387_v1, %s412_s21 }
  0x7f   : > { %v238_v2 = vpop.permute.xlu0 %237 }
  0x80   : > { %v240_v4 = vmul.f32 %v238_v2, %v225_v3 }
  0x87   : > { %v242_v5 = vpop.permute.xlu0 %241 }
  0x88   : > { %v244_v6 = vadd.f32 %v242_v5, %v240_v4 }
  0x8a   : > { %v245_v7 = vmax.f32 %v244_v6, 0.0 }
  0x8c   : > { %247 = vrot.lane.b32.xlu1 %v245_v7, %s413_s28 }
  0xfe   : > { %v248_v13 = vpop.permute.xlu1 %247 }
  0xff   : > { %v250_v14 = vadd.f32 %v248_v13, %v236_v12 }
 0x101   : > { %v251_v15 = vpack.c.bf16 %v250_v14, %v250_v14 }
 0x103   : > { %357 = vmatmul.msk.bf16.vlgmr.msra.gmra.mxu0 %vm253_vm1, %v251_v15 }
 0x180   : > { %v270_v16 = vpop.f32.mrf.mxu0 }
 0x181   : > { %275 = vst.msk [vmem:[%s223_s7] sm:$0xff] %vm274_vm2, %v270_v16 }
 0x188   : > { %v272_v17 = vpop.f32.mrf.mxu0 }
 0x189 PF: > { %s14_s17 = sadd.s32 1, %s410_s17   ;;  %s486_s15 = smov %s406_s16 }
 0x18a   : > { %p11_p5 = scmp.ge.s32.totalorder %s14_s17, 4   ;;  %s487_s16 = smov %s489_s18 }
 0x18c   :  { %13 = sbr.rel (!%p11_p5) target bundleno = 2 (0x2), region = 66 }

</bundles_post_ra>
